<compile_context>
chip_gen: v7x
topology: tpu7x:2x2x1
jax: 0.10.0
libtpu: 0.0.40
codegen_flags: <defaults>
</compile_context>

<pallas_src>
import jax
import jax.numpy as jnp
from jax import lax
from jax.experimental import pallas as pl
from jax.experimental.pallas import tpu as pltpu


def _round_up(n, m):
    return ((n + m - 1) // m) * m


def wgan_d_kernel(x_ref, w1_ref, b1_ref, w2_ref, b2_ref, w3_ref, b3_ref, o_ref):
    # x_ref: (TB, IN) f32, straight from HBM (no wrapper pre-pass).
    x = x_ref[...].astype(jnp.bfloat16)                                 # (TB, IN)
    # fc1 as an "NT" matmul: contract the feature (minor) axis of both W1 and x.
    # (64, IN) x (TB, IN)^T -> (64, TB); f32 accumulation on the MXU.  This
    # produces the batch-in-lanes layout directly (no explicit x transpose).
    h1 = lax.dot_general(w1_ref[...], x,
                         dimension_numbers=(((1,), (1,)), ((), ())),
                         preferred_element_type=jnp.float32)
    h1 = jnp.maximum(h1 + b1_ref[...], 0.0)                             # (64, TB)
    # fc2 + relu : (32, 64) @ (64, TB) -> (32, TB)
    h2 = jnp.dot(w2_ref[...], h1.astype(jnp.bfloat16),
                 preferred_element_type=jnp.float32)
    h2 = jnp.maximum(h2 + b2_ref[...], 0.0)                             # (32, TB)
    # fc3 (32 -> 1): VPU multiply + sublane (XLU) reduce; stays lane-dense.
    z = jnp.sum(h2 * w3_ref[...], axis=0, keepdims=True) + b3_ref[...]  # (1, TB)
    # sigmoid: exp on EUP + approx reciprocal on EUP -> essentially free.
    o_ref[...] = pl.reciprocal(1.0 + jnp.exp(-z), approx=True)


def _tile_and_vmem(batch):
    """Generation-aware batch tile (TB) and VMEM limit.

    Peak VMEM per step at TB rows is ~2 KiB/row (the f32 (TB, 32) x tile lane-
    pads 32->128 and is double-buffered, plus f32 intermediates), i.e. ~16 MiB
    at TB=8192.
    """
    try:
        vmem_cap = pltpu.get_tpu_info().vmem_capacity_bytes
    except Exception:  # conservative fallback if the query is unavailable
        vmem_cap = 128 * 1024 * 1024
    if vmem_cap >= 100 * 1024 * 1024:
        # v5e / v6e: 128 MiB physical VMEM; raise the scoped limit past the
        # 16 MiB v5e default so the 8192-row tile fits comfortably.
        tb_target, vmem_limit = 8192, 64 * 1024 * 1024
    else:
        # v7x: 64 MiB physical / 32 MiB scoped default; ~16-18 MiB peak fits.
        tb_target, vmem_limit = 8192, None

    b128 = _round_up(max(batch, 1), 128)
    if b128 >= 256:
        # Keep at least 2 grid steps so ("parallel",) gives both v7x cores work.
        tb = min(tb_target, _round_up(pl.cdiv(b128, 2), 128))
    else:
        tb = b128  # single 128-row tile for tiny batches
    return tb, vmem_limit


def wgan_d_forward(x, params):
    """x: (B, input_size) f32; params in PyTorch layout (W: (out, in), b: (out,))."""
    w1, b1, w2, b2, w3, b3 = params
    B, in_features = x.shape
    hidden1, hidden2 = w1.shape[0], w2.shape[0]

    TB, vmem_limit = _tile_and_vmem(B)

    # Only tiny batches (< 128 rows) get padded; large batches stream untouched
    # and the ragged last tile's padded rows/outputs are simply discarded.
    x_in, Bp = x, B
    if B < TB:
        x_in = jnp.pad(x, ((0, TB - B), (0, 0)))
        Bp = TB
    grid = (pl.cdiv(Bp, TB),)

    # Tiny parameter-side casts/reshapes only (a few KiB).
    w1b = w1.astype(jnp.bfloat16)                    # (64, IN)
    w2b = w2.astype(jnp.bfloat16)                    # (32, 64)
    b1c = b1.reshape(-1, 1).astype(jnp.float32)      # (64, 1)
    b2c = b2.reshape(-1, 1).astype(jnp.float32)      # (32, 1)
    w3c = w3.reshape(-1, 1).astype(jnp.float32)      # (32, 1)
    b3c = b3.reshape(1, 1).astype(jnp.float32)       # (1, 1)

    const = lambda a: pl.BlockSpec(a.shape, lambda i: (0, 0))
    cost = pl.CostEstimate(
        flops=2 * B * (in_features * hidden1 + hidden1 * hidden2 + hidden2),
        transcendentals=B,
        bytes_accessed=B * (in_features * 4 + 4)
        + 4 * (w1.size + w2.size + w3.size + b1.size + b2.size + b3.size),
    )

    out = pl.pallas_call(
        wgan_d_kernel,
        out_shape=jax.ShapeDtypeStruct((1, Bp), jnp.float32),
        grid=grid,
        in_specs=[
            pl.BlockSpec((TB, in_features), lambda i: (i, 0)),   # f32 x tile
            const(w1b), const(b1c), const(w2b), const(b2c), const(w3c), const(b3c),
        ],
        out_specs=pl.BlockSpec((1, TB), lambda i: (0, i)),        # lane-dense
        compiler_params=pltpu.CompilerParams(
            dimension_semantics=("parallel",),                    # megacore on v7x
            vmem_limit_bytes=vmem_limit),
        cost_estimate=cost,
    )(x_in, w1b, b1c, w2b, b2c, w3c, b3c)

    return out[0, :B].reshape(B, 1)


def init_params(key, input_size=32):
    # PyTorch-style init/layout: W is (out, in), b is (out,), U(+-1/sqrt(fan_in)).
    def linear(key, fan_in, fan_out):
        kw, kb = jax.random.split(key)
        bound = 1.0 / jnp.sqrt(fan_in)
        w = jax.random.uniform(kw, (fan_out, fan_in), jnp.float32, -bound, bound)
        b = jax.random.uniform(kb, (fan_out,), jnp.float32, -bound, bound)
        return w, b

    k1, k2, k3 = jax.random.split(key, 3)
    w1, b1 = linear(k1, input_size, 64)
    w2, b2 = linear(k2, 64, 32)
    w3, b3 = linear(k3, 32, 1)
    return (w1, b1, w2, b2, w3, b3)


def reference_forward(x, params):
    w1, b1, w2, b2, w3, b3 = params
    h1 = jnp.maximum(x @ w1.T + b1, 0.0)
    h2 = jnp.maximum(h1 @ w2.T + b2, 0.0)
    return jax.nn.sigmoid(h2 @ w3.T + b3)


if __name__ == "__main__":
    key = jax.random.PRNGKey(0)
    kx, kp = jax.random.split(key)
    B, input_size = 8, 32
    x = jax.random.normal(kx, (B, input_size), jnp.float32)
    params = init_params(kp, input_size)

    out = wgan_d_forward(x, params)
    out = jax.block_until_ready(out)

    ref = reference_forward(x, params)
    assert out.shape == (B, 1)
    # bf16 matmul operands + approx reciprocal -> loosened tolerance vs f32 ref.
    assert jnp.allclose(out, ref, atol=2e-2, rtol=2e-2), (
        f"max abs diff {jnp.max(jnp.abs(out - ref))}")
    print("KERNEL_OK")
</pallas_src>

<mosaic_0001>
module attributes {stable_mosaic.version = 11 : i64} {
  func.func @wgan_d_kernel(%arg0: i32, %arg1: memref<128x32xf32, #tpu.memory_space<vmem>>, %arg2: memref<64x32xbf16, #tpu.memory_space<vmem>>, %arg3: memref<64x1xf32, #tpu.memory_space<vmem>>, %arg4: memref<32x64xbf16, #tpu.memory_space<vmem>>, %arg5: memref<32x1xf32, #tpu.memory_space<vmem>>, %arg6: memref<32x1xf32, #tpu.memory_space<vmem>>, %arg7: memref<1x1xf32, #tpu.memory_space<vmem>>, %arg8: memref<1x128xf32, #tpu.memory_space<vmem>>) attributes {dimension_semantics = [#tpu.dimension_semantics<parallel>], iteration_bounds = array<i64: 1>, scalar_prefetch = 0 : i64, scratch_operands = 0 : i64, tpu.core_type = #tpu.core_type<tc>, window_params = [{transform_indices = @transform_0, window_bounds = array<i64: 128, 32>}, {pipeline_mode = #tpu.pipeline_mode<synchronous>, transform_indices = @transform_1, window_bounds = array<i64: 64, 32>}, {pipeline_mode = #tpu.pipeline_mode<synchronous>, transform_indices = @transform_2, window_bounds = array<i64: 64, 1>}, {pipeline_mode = #tpu.pipeline_mode<synchronous>, transform_indices = @transform_3, window_bounds = array<i64: 32, 64>}, {pipeline_mode = #tpu.pipeline_mode<synchronous>, transform_indices = @transform_4, window_bounds = array<i64: 32, 1>}, {pipeline_mode = #tpu.pipeline_mode<synchronous>, transform_indices = @transform_5, window_bounds = array<i64: 32, 1>}, {pipeline_mode = #tpu.pipeline_mode<synchronous>, transform_indices = @transform_6, window_bounds = array<i64: 1, 1>}, {transform_indices = @transform_7, window_bounds = array<i64: 1, 128>}]} {
    %c0 = arith.constant 0 : index
    %c0_0 = arith.constant 0 : index
    %0 = vector.load %arg1[%c0, %c0_0] : memref<128x32xf32, #tpu.memory_space<vmem>>, vector<128x32xf32>
    %1 = arith.truncf %0 : vector<128x32xf32> to vector<128x32xbf16>
    %c0_1 = arith.constant 0 : index
    %c0_2 = arith.constant 0 : index
    %2 = vector.load %arg2[%c0_1, %c0_2] : memref<64x32xbf16, #tpu.memory_space<vmem>>, vector<64x32xbf16>
    %cst = arith.constant dense<0.000000e+00> : vector<64x128xf32>
    %3 = tpu.matmul %2, %1, %cst {dimension_numbers = #tpu.dot_dimension_numbers<[1], [1], [0], [0], [0, 0, 1, 0], [], []>} : vector<64x32xbf16>, vector<128x32xbf16>, vector<64x128xf32> -> vector<64x128xf32>
    %c0_3 = arith.constant 0 : index
    %c0_4 = arith.constant 0 : index
    %4 = vector.load %arg3[%c0_3, %c0_4] : memref<64x1xf32, #tpu.memory_space<vmem>>, vector<64x1xf32>
    %5 = vector.broadcast %4 : vector<64x1xf32> to vector<64x128xf32>
    %6 = arith.addf %3, %5 : vector<64x128xf32>
    %cst_5 = arith.constant 0.000000e+00 : f32
    %7 = vector.broadcast %cst_5 : f32 to vector<64x128xf32>
    %8 = arith.maximumf %6, %7 : vector<64x128xf32>
    %c0_6 = arith.constant 0 : index
    %c0_7 = arith.constant 0 : index
    %9 = vector.load %arg4[%c0_6, %c0_7] : memref<32x64xbf16, #tpu.memory_space<vmem>>, vector<32x64xbf16>
    %10 = arith.truncf %8 : vector<64x128xf32> to vector<64x128xbf16>
    %cst_8 = arith.constant dense<0.000000e+00> : vector<32x128xf32>
    %11 = tpu.matmul %9, %10, %cst_8 {dimension_numbers = #tpu.dot_dimension_numbers<[1], [0], [0], [1], [0, 0, 1, 1], [], []>} : vector<32x64xbf16>, vector<64x128xbf16>, vector<32x128xf32> -> vector<32x128xf32>
    %c0_9 = arith.constant 0 : index
    %c0_10 = arith.constant 0 : index
    %12 = vector.load %arg5[%c0_9, %c0_10] : memref<32x1xf32, #tpu.memory_space<vmem>>, vector<32x1xf32>
    %13 = vector.broadcast %12 : vector<32x1xf32> to vector<32x128xf32>
    %14 = arith.addf %11, %13 : vector<32x128xf32>
    %cst_11 = arith.constant 0.000000e+00 : f32
    %15 = vector.broadcast %cst_11 : f32 to vector<32x128xf32>
    %16 = arith.maximumf %14, %15 : vector<32x128xf32>
    %c0_12 = arith.constant 0 : index
    %c0_13 = arith.constant 0 : index
    %17 = vector.load %arg6[%c0_12, %c0_13] : memref<32x1xf32, #tpu.memory_space<vmem>>, vector<32x1xf32>
    %18 = vector.broadcast %17 : vector<32x1xf32> to vector<32x128xf32>
    %19 = arith.mulf %16, %18 : vector<32x128xf32>
    %cst_14 = arith.constant dense<0.000000e+00> : vector<128xf32>
    %20 = vector.multi_reduction <add>, %19, %cst_14 [0] : vector<32x128xf32> to vector<128xf32>
    %21 = vector.shape_cast %20 : vector<128xf32> to vector<1x128xf32>
    %c0_15 = arith.constant 0 : index
    %c0_16 = arith.constant 0 : index
    %22 = vector.load %arg7[%c0_15, %c0_16] : memref<1x1xf32, #tpu.memory_space<vmem>>, vector<1x1xf32>
    %23 = vector.broadcast %22 : vector<1x1xf32> to vector<1x128xf32>
    %24 = arith.addf %21, %23 : vector<1x128xf32>
    %cst_17 = arith.constant 0.000000e+00 : f32
    %25 = vector.broadcast %cst_17 : f32 to vector<1x128xf32>
    %26 = arith.subf %25, %24 : vector<1x128xf32>
    %27 = math.exp %26 : vector<1x128xf32>
    %cst_18 = arith.constant 1.000000e+00 : f32
    %28 = vector.broadcast %cst_18 : f32 to vector<1x128xf32>
    %29 = arith.addf %28, %27 : vector<1x128xf32>
    %30 = tpu.reciprocal %29 {approx = true} : vector<1x128xf32> -> vector<1x128xf32>
    %c0_19 = arith.constant 0 : index
    %c0_20 = arith.constant 0 : index
    %31 = vector.load %arg8[%c0_19, %c0_20] : memref<1x128xf32, #tpu.memory_space<vmem>>, vector<1x128xf32>
    tpu.vector_store %arg8[%c0_19, %c0_20], %30 {strides = array<i32>} : memref<1x128xf32, #tpu.memory_space<vmem>>, vector<1x128xf32>,
    return
  }
  func.func @transform_0(%arg0: i32) -> (i32, i32) {
    %c0_i32 = arith.constant 0 : i32
    %c0_i32_0 = arith.constant 0 : i32
    return %arg0, %c0_i32 : i32, i32
  }
  func.func @transform_1(%arg0: i32) -> (i32, i32) {
    %c0_i32 = arith.constant 0 : i32
    %c0_i32_0 = arith.constant 0 : i32
    %c0_i32_1 = arith.constant 0 : i32
    return %c0_i32, %c0_i32_0 : i32, i32
  }
  func.func @transform_2(%arg0: i32) -> (i32, i32) {
    %c0_i32 = arith.constant 0 : i32
    %c0_i32_0 = arith.constant 0 : i32
    %c0_i32_1 = arith.constant 0 : i32
    return %c0_i32, %c0_i32_0 : i32, i32
  }
  func.func @transform_3(%arg0: i32) -> (i32, i32) {
    %c0_i32 = arith.constant 0 : i32
    %c0_i32_0 = arith.constant 0 : i32
    %c0_i32_1 = arith.constant 0 : i32
    return %c0_i32, %c0_i32_0 : i32, i32
  }
  func.func @transform_4(%arg0: i32) -> (i32, i32) {
    %c0_i32 = arith.constant 0 : i32
    %c0_i32_0 = arith.constant 0 : i32
    %c0_i32_1 = arith.constant 0 : i32
    return %c0_i32, %c0_i32_0 : i32, i32
  }
  func.func @transform_5(%arg0: i32) -> (i32, i32) {
    %c0_i32 = arith.constant 0 : i32
    %c0_i32_0 = arith.constant 0 : i32
    %c0_i32_1 = arith.constant 0 : i32
    return %c0_i32, %c0_i32_0 : i32, i32
  }
  func.func @transform_6(%arg0: i32) -> (i32, i32) {
    %c0_i32 = arith.constant 0 : i32
    %c0_i32_0 = arith.constant 0 : i32
    %c0_i32_1 = arith.constant 0 : i32
    return %c0_i32, %c0_i32_0 : i32, i32
  }
  func.func @transform_7(%arg0: i32) -> (i32, i32) {
    %c0_i32 = arith.constant 0 : i32
    %c0_i32_0 = arith.constant 0 : i32
    return %c0_i32, %arg0 : i32, i32
  }
}

</mosaic_0001>

<bundles_post_ra>
// kernel: tpu_custom_call.1
= control target key start
LH: loop header
LB: loop body
LE: loop exit
PB: predicated region body
PF: predicated region fallthrough
CT: control target
= control target key end

     0   :  { %s931_s0 = inlined_call_operand.hbm [shape: f32[128,32], index: 0, kind: input, shape index: {}]   ;;  %s932_s1 = inlined_call_operand.hbm [shape: bf16[64,32], index: 1, kind: input, shape index: {}]   ;;  %s933_s2 = inlined_call_operand.hbm [shape: f32[64,1], index: 2, kind: input, shape index: {}]   ;;  %s934_s3 = inlined_call_operand.hbm [shape: bf16[32,64], index: 3, kind: input, shape index: {}]   ;;  %s935_s4 = inlined_call_operand.hbm [shape: f32[32,1], index: 4, kind: input, shape index: {}]   ;;  %s936_s5 = inlined_call_operand.hbm [shape: f32[32,1], index: 5, kind: input, shape index: {}]   ;;  %s937_s6 = inlined_call_operand.<no memory space> [shape: f32[1,1], index: 6, kind: input, shape index: {}]   ;;  %s938_s7 = inlined_call_operand.hbm [shape: f32[1,128], index: 7, kind: output, shape index: {}]  }
   0x1   :  { %v12_v0 = vstv %s937_s6 }
   0x2   :  { %13 = vst [vmem:[#allocation2] sm:$0x1] %v12_v0 }
   0x3   :  { %14 = vsyncpa [#allocation4], 0 }
   0x4   :  { %15 = vsyncpa [#allocation7], 0 }
   0x5   :  { %16 = vsyncpa [#allocation10], 0 }
   0x6   :  { %17 = vsyncpa [#allocation13], 0 }
   0x7   :  { %18 = vsyncpa [#allocation5], 0  ;;  %s758_s26 = smov [#allocation6]   ;;  %s594_s30 = scalar_lea.hbm %s932_s1, 512 }
   0x8   :  { %s36_s27 = sshll.u32 %s758_s26, 4  ;;  %p595_p0 = scmp.ne.s32.totalorder %s932_s1, %s594_s30  ;;  %s37_s27 = int_to_ptr.vmem [resolvable:$true] %s36_s27 }
   0x9   :  { %p598_p1 = scmp.lt.u32.totalorder %s594_s30, %s932_s1 }
   0xb   :  { %p600_p2 = pnand %p598_p1, %p595_p0 }
   0xd   :  { %603 = shalt.err (!%p600_p2)
}
   0xe   :  { %s604_s6 = scalar_lea.vmem %s37_s27, 512  ;;  %p609_p4 = scmp.lt.s32.totalorder %s37_s27, %s37_s27 }
   0xf   :  { %p605_p3 = scmp.ne.s32.totalorder %s37_s27, %s604_s6  ;;  %p610_p5 = scmp.lt.s32.totalorder %s604_s6, %s604_s6 }
  0x11   :  { %p611_p6 = por %p610_p5, %p609_p4 }
  0x13   :  { %p612_p7 = pnand %p611_p6, %p605_p3 }
  0x15   :  { %615 = shalt.err (!%p612_p7)
}
  0x16   :  { %s759_s12 = smov 64   ;;  %s760_s13 = smov 4  }
  0x17   :  { %42 = dma.hbm_to_vmem [thread:$0]  %s932_s1, 512, %s37_s27, [#allocation7], %s759_s12, %s759_s12, %s760_s13  }
  0x18   :  { %s761_s16 = smov [#allocation9]   ;;  %s762_s18 = smov [#allocation3]  }
  0x19   :  { %s60_s17 = sshll.u32 %s761_s16, 4  ;;  %s24_s19 = sshll.u32 %s762_s18, 4  ;;  %s61_s17 = int_to_ptr.vmem [resolvable:$true] %s60_s17  ;;  %s25_s19 = int_to_ptr.vmem [resolvable:$true] %s24_s19 }
  0x1a   :  { %s616_s22 = scalar_lea.hbm %s934_s3, 256 }
  0x1b   :  { %p617_p8 = scmp.ne.s32.totalorder %s934_s3, %s616_s22  ;;  %p620_p9 = scmp.lt.u32.totalorder %s616_s22, %s934_s3 }
  0x1d   :  { %p622_p10 = pnand %p620_p9, %p617_p8 }
  0x1f   :  { %625 = shalt.err (!%p622_p10)
}
  0x20   :  { %s626_s1 = scalar_lea.vmem %s61_s17, 256  ;;  %p631_p12 = scmp.lt.s32.totalorder %s61_s17, %s61_s17 }
  0x21   :  { %p627_p11 = scmp.ne.s32.totalorder %s61_s17, %s626_s1  ;;  %p632_p13 = scmp.lt.s32.totalorder %s626_s1, %s626_s1 }
  0x23   :  { %p633_p0 = por %p632_p13, %p631_p12 }
  0x25   :  { %p634_p1 = pnand %p633_p0, %p627_p11 }
  0x27   :  { %637 = shalt.err (!%p634_p1)
}
  0x28   :  { %66 = dma.hbm_to_vmem [thread:$0]  %s934_s3, 256, %s61_s17, [#allocation10], %s759_s12, %s759_s12, %s760_s13  }
  0x29   :  { %s638_s8 = scalar_lea.hbm %s931_s0, 2048 }
  0x2a   :  { %p639_p2 = scmp.ne.s32.totalorder %s931_s0, %s638_s8  ;;  %p642_p3 = scmp.lt.u32.totalorder %s638_s8, %s931_s0 }
  0x2c   :  { %p644_p4 = pnand %p642_p3, %p639_p2 }
  0x2e   :  { %647 = shalt.err (!%p644_p4)
}
  0x2f   :  { %s648_s14 = scalar_lea.vmem %s25_s19, 2048  ;;  %p653_p6 = scmp.lt.s32.totalorder %s25_s19, %s25_s19 }
  0x30   :  { %p649_p5 = scmp.ne.s32.totalorder %s25_s19, %s648_s14  ;;  %p654_p7 = scmp.lt.s32.totalorder %s648_s14, %s648_s14 }
  0x32   :  { %p655_p8 = por %p654_p7, %p653_p6 }
  0x34   :  { %p656_p9 = pnand %p655_p8, %p649_p5 }
  0x36   :  { %659 = shalt.err (!%p656_p9)
}
  0x37   :  { %s763_s3 = smov 128   ;;  %s764_s12 = smov 8  }
  0x38   :  { %30 = dma.hbm_to_vmem [thread:$0]  %s931_s0, 2048, %s25_s19, [#allocation4], %s763_s3, %s763_s3, %s764_s12  }
  0x39   :  { %s765_s16 = smov [#allocation8]   ;;  %s766_s18 = smov [#allocation11]  }
  0x3a   :  { %s48_s17 = sshll.u32 %s765_s16, 4  ;;  %s72_s20 = sshll.u32 %s766_s18, 4  ;;  %s49_s17 = int_to_ptr.vmem [resolvable:$true] %s48_s17  ;;  %s73_s20 = int_to_ptr.vmem [resolvable:$true] %s72_s20 }
  0x3b   :  { %s660_s23 = scalar_lea.hbm %s933_s2, 1024 }
  0x3c   :  { %p661_p10 = scmp.ne.s32.totalorder %s933_s2, %s660_s23  ;;  %p664_p11 = scmp.lt.u32.totalorder %s660_s23, %s933_s2 }
  0x3e   :  { %p666_p12 = pnand %p664_p11, %p661_p10 }
  0x40   :  { %669 = shalt.err (!%p666_p12)
}
  0x41   :  { %s670_s0 = scalar_lea.vmem %s49_s17, 1024  ;;  %p675_p0 = scmp.lt.s32.totalorder %s49_s17, %s49_s17 }
  0x42   :  { %p671_p13 = scmp.ne.s32.totalorder %s49_s17, %s670_s0  ;;  %p676_p1 = scmp.lt.s32.totalorder %s670_s0, %s670_s0 }
  0x44   :  { %p677_p2 = por %p676_p1, %p675_p0 }
  0x46   :  { %p678_p3 = pnand %p677_p2, %p671_p13 }
  0x48   :  { %681 = shalt.err (!%p678_p3)
}
  0x49   :  { %54 = dma.hbm_to_vmem [thread:$0]  %s933_s2, 1024, %s49_s17, [#allocation7], %s763_s3, %s763_s3, %s764_s12  }
  0x4a   :  { %s682_s30 = scalar_lea.hbm %s935_s4, 512 }
  0x4b   :  { %p683_p4 = scmp.ne.s32.totalorder %s935_s4, %s682_s30  ;;  %p686_p5 = scmp.lt.u32.totalorder %s682_s30, %s935_s4 }
  0x4d   :  { %p688_p6 = pnand %p686_p5, %p683_p4 }
  0x4f   :  { %691 = shalt.err (!%p688_p6)
}
  0x50   :  { %s692_s6 = scalar_lea.vmem %s73_s20, 512  ;;  %p697_p8 = scmp.lt.s32.totalorder %s73_s20, %s73_s20 }
  0x51   :  { %p693_p7 = scmp.ne.s32.totalorder %s73_s20, %s692_s6  ;;  %p698_p9 = scmp.lt.s32.totalorder %s692_s6, %s692_s6 }
  0x53   :  { %p699_p10 = por %p698_p9, %p697_p8 }
  0x55   :  { %p700_p11 = pnand %p699_p10, %p693_p7 }
  0x57   :  { %703 = shalt.err (!%p700_p11)
}
  0x58   :  { %78 = dma.hbm_to_vmem [thread:$0]  %s935_s4, 512, %s73_s20, [#allocation10], %s763_s3, %s763_s3, %s764_s12  }
  0x59   :  { %s767_s13 = smov [#allocation12]   ;;  %s704_s18 = scalar_lea.hbm %s936_s5, 512 }
  0x5a   :  { %s84_s15 = sshll.u32 %s767_s13, 4  ;;  %p705_p12 = scmp.ne.s32.totalorder %s936_s5, %s704_s18  ;;  %s85_s15 = int_to_ptr.vmem [resolvable:$true] %s84_s15 }
  0x5b   :  { %p708_p13 = scmp.lt.u32.totalorder %s704_s18, %s936_s5 }
  0x5d   :  { %p710_p0 = pnand %p708_p13, %p705_p12 }
  0x5f   :  { %713 = shalt.err (!%p710_p0)
}
  0x60   :  { %s714_s25 = scalar_lea.vmem %s85_s15, 512  ;;  %p719_p2 = scmp.lt.s32.totalorder %s85_s15, %s85_s15 }
  0x61   :  { %p715_p1 = scmp.ne.s32.totalorder %s85_s15, %s714_s25  ;;  %p720_p3 = scmp.lt.s32.totalorder %s714_s25, %s714_s25 }
  0x63   :  { %p721_p4 = por %p720_p3, %p719_p2 }
  0x65   :  { %p722_p5 = pnand %p721_p4, %p715_p1 }
  0x67   :  { %725 = shalt.err (!%p722_p5)
}
  0x68   :  { %90 = dma.hbm_to_vmem [thread:$0]  %s936_s5, 512, %s85_s15, [#allocation13], %s763_s3, %s763_s3, %s764_s12  }
  0x69   :  { %748 = dma.done.wait [#allocation4], 2048  }
  0x6a   :  { %749 = vsyncadd [#allocation4], 4294965248 }
  0x6b   :  { %750 = dma.done.wait [#allocation7], 1536  }
  0x6c   :  { %751 = vsyncadd [#allocation7], 4294965760 }
  0x6d   :  { %752 = dma.done.wait [#allocation10], 768  }
  0x6e   :  { %753 = vsyncadd [#allocation10], 4294966528 }
  0x6f   :  { %754 = dma.done.wait [#allocation13], 512  }
  0x70   :  { %755 = vsyncadd [#allocation13], 4294966784  ;;  %v768_v1 = vmov 0   ;;  %v112_v2 = vld [vmem:[#allocation3] sm:$0xff]  ;;  %v113_v3 = vld [vmem:[#allocation3 + $0x8] sm:$0xff]  ;;  %vm212_vm0 = vcmask 261120  }
  0x71   :  { %582 = vset.pattern.permute.xlu0 %v768_v1  ;;  %583 = vset.pattern.permute.xlu1 %v768_v1  ;;  %v114_v4 = vld [vmem:[#allocation3 + $0x10] sm:$0xff]  ;;  %v128_v5 = vpack.c.bf16 %v113_v3, %v112_v2  ;;  %v115_v6 = vld [vmem:[#allocation3 + $0x18] sm:$0xff]  ;;  %v116_v9 = vld [vmem:[#allocation3 + $0x20] sm:$0xff]  ;;  %vm364_vm1 = vcmask 523264   ;;  %s769_s5 = smov [#allocation14]  }
  0x72   :  { %v129_v7 = vpack.c.bf16 %v115_v6, %v114_v4  ;;  %v117_v10 = vld [vmem:[#allocation3 + $0x28] sm:$0xff]  ;;  %v584_v11 = vld [vmem:[#allocation6] sm:$0xff]   ;;  %v146_v15 = vld [vmem:[#allocation8 + $0x10] sm:$0xff]  ;;  %s484_s3 = sshll.u32 %s769_s5, 4  ;;  %s485_s3 = int_to_ptr.vmem [resolvable:$true] %s484_s3 }
  0x73   :  { %562 = vmatprep.subr.msk.bf16.mxu0 %vm212_vm0, %v128_v5  ;;  %v226_v8 = vsel %vm212_vm0, %v128_v5, 0  ;;  %542 = vmatprep.mubr.msk.bf16.mxu0 %vm212_vm0, %v584_v11  ;;  %v130_v13 = vpack.c.bf16 %v117_v10, %v116_v9  ;;  %v144_v14 = vld [vmem:[#allocation8] sm:$0xff]  ;;  %v145_v16 = vld [vmem:[#allocation8 + $0x8] sm:$0xff]  ;;  %v147_v17 = vld [vmem:[#allocation8 + $0x18] sm:$0xff]  ;;  %s726_s12 = scalar_lea.vmem %s485_s3, 16  ;;  %s730_s26 = scalar_lea.vmem %s485_s3, 32 }
  0x74   :  { %527 = vmatpush3.bf16.xpose.msra.mxu0 %v226_v8  ;;  %v229_v12 = vsel %vm212_vm0, %v129_v7, 0  ;;  %154 = vperm.xlu0 %582, %v144_v14   ;;  %v118_v18 = vld [vmem:[#allocation3 + $0x30] sm:$0xff]  ;;  %v119_v19 = vld [vmem:[#allocation3 + $0x38] sm:$0xff]  ;;  %v148_v20 = vld [vmem:[#allocation8 + $0x20] sm:$0xff]  ;;  %p727_p6 = scmp.ne.s32.totalorder %s485_s3, %s726_s12  ;;  %p731_p7 = scmp.lt.s32.totalorder %s485_s3, %s485_s3 }
  0x75   :  { %563 = vmatprep.subr.msk.bf16.mxu0 %vm212_vm0, %v129_v7  ;;  %164 = vperm.xlu1 %583, %v146_v15   ;;  %v149_v21 = vld [vmem:[#allocation8 + $0x28] sm:$0xff]  ;;  %v232_v22 = vsel %vm212_vm0, %v130_v13, 0  ;;  %v131_v23 = vpack.c.bf16 %v119_v19, %v118_v18  ;;  %v150_v24 = vld [vmem:[#allocation8 + $0x30] sm:$0xff]  ;;  %v151_v25 = vld [vmem:[#allocation8 + $0x38] sm:$0xff]  ;;  %p732_p8 = scmp.lt.s32.totalorder %s730_s26, %s726_s12 }
  0x76   :  { %v120_v26 = vld [vmem:[#allocation3 + $0x40] sm:$0xff]  ;;  %v121_v27 = vld [vmem:[#allocation3 + $0x48] sm:$0xff]  ;;  %v330_v28 = vld [vmem:[#allocation11] sm:$0xff] }
  0x77   :  { %v331_v29 = vld [vmem:[#allocation11 + $0x8] sm:$0xff]  ;;  %v235_v30 = vsel %vm212_vm0, %v131_v23, 0  ;;  %v132_v31 = vpack.c.bf16 %v121_v27, %v120_v26  ;;  %v332_v32 = vld [vmem:[#allocation11 + $0x10] sm:$0xff]  ;;  %v333_v33 = vld [vmem:[#allocation11 + $0x18] sm:$0xff]  ;;  %p733_p9 = por %p732_p8, %p731_p7 }
  0x78   :  { %159 = vperm.xlu0 %582, %v145_v16   ;;  %v122_v34 = vld [vmem:[#allocation3 + $0x50] sm:$0xff]  ;;  %v123_v35 = vld [vmem:[#allocation3 + $0x58] sm:$0xff]  ;;  %v426_v40 = vld [vmem:[#allocation12 + $0x10] sm:$0xff] }
  0x79   :  { %169 = vperm.xlu1 %583, %v147_v17   ;;  %v424_v36 = vld [vmem:[#allocation12] sm:$0xff]  ;;  %v425_v37 = vld [vmem:[#allocation12 + $0x8] sm:$0xff]  ;;  %v238_v38 = vsel %vm212_vm0, %v132_v31, 0  ;;  %v133_v39 = vpack.c.bf16 %v123_v35, %v122_v34  ;;  %v427_v41 = vld [vmem:[#allocation12 + $0x18] sm:$0xff]  ;;  %p734_p10 = pnand %p733_p9, %p727_p6 }
  0x7a   :  { %v124_v42 = vld [vmem:[#allocation3 + $0x60] sm:$0xff]  ;;  %v125_v43 = vld [vmem:[#allocation3 + $0x68] sm:$0xff]  ;;  %v461_v44 = vld [vmem:[#allocation2] sm:$0x1] }
  0x7b   :  { %v241_v45 = vsel %vm212_vm0, %v133_v39, 0  ;;  %v134_v46 = vpack.c.bf16 %v125_v43, %v124_v42  ;;  %v126_v47 = vld [vmem:[#allocation3 + $0x70] sm:$0xff]  ;;  %v127_v48 = vld [vmem:[#allocation3 + $0x78] sm:$0xff]  ;;  %v585_v52 = vld [vmem:[#allocation6 + $0x8] sm:$0xff]  }
  0x7c   :  { %529 = vmatpush3.bf16.xpose.msra.mxu0 %v229_v12  ;;  %174 = vperm.xlu0 %582, %v148_v20   ;;  %v135_v50 = vpack.c.bf16 %v127_v48, %v126_v47  ;;  %v586_v53 = vld [vmem:[#allocation6 + $0x10] sm:$0xff]   ;;  %v587_v54 = vld [vmem:[#allocation6 + $0x18] sm:$0xff]   ;;  %v588_v55 = vld [vmem:[#allocation9] sm:$0xff]  }
  0x7d   :  { %564 = vmatprep.subr.msk.bf16.mxu0 %vm212_vm0, %v130_v13  ;;  %179 = vperm.xlu1 %583, %v149_v21   ;;  %v244_v49 = vsel %vm212_vm0, %v134_v46, 0 }
  0x7e   :  { %v247_v51 = vsel %vm212_vm0, %v135_v50, 0  ;;  %558 = vmatprep.mubr.msk.bf16.mxu1 %vm364_vm1, %v588_v55  ;;  %v467_v55 = vlaneseq }
  0x80   :  { %184 = vperm.xlu0 %582, %v150_v24  }
  0x81   :  { %189 = vperm.xlu1 %583, %v151_v25  }
  0x84   :  { %531 = vmatpush3.bf16.xpose.msra.mxu0 %v232_v22  ;;  %336 = vperm.xlu0 %582, %v330_v28   ;;  %v589_v28 = vld [vmem:[#allocation9 + $0x8] sm:$0xff]  }
  0x85   :  { %565 = vmatprep.subr.msk.bf16.mxu0 %vm212_vm0, %v131_v23  ;;  %341 = vperm.xlu1 %583, %v331_v29  }
  0x88   :  { %346 = vperm.xlu0 %582, %v332_v32  }
  0x89   :  { %351 = vperm.xlu1 %583, %v333_v33  }
  0x8c   :  { %533 = vmatpush3.bf16.xpose.msra.mxu0 %v235_v30  ;;  %430 = vperm.xlu0 %582, %v424_v36  }
  0x8d   :  { %566 = vmatprep.subr.msk.bf16.mxu0 %vm212_vm0, %v132_v31  ;;  %435 = vperm.xlu1 %583, %v425_v37  }
  0x90   :  { %440 = vperm.xlu0 %582, %v426_v40  }
  0x91   :  { %445 = vperm.xlu1 %583, %v427_v41  }
  0x94   :  { %535 = vmatpush3.bf16.xpose.msra.mxu0 %v238_v38  ;;  %464 = vperm.xlu0 %582, %v461_v44  }
  0x95   :  { %567 = vmatprep.subr.msk.bf16.mxu0 %vm212_vm0, %v133_v39 }
  0x9c   :  { %537 = vmatpush3.bf16.xpose.msra.mxu0 %v241_v45 }
  0x9d   :  { %568 = vmatprep.subr.msk.bf16.mxu0 %vm212_vm0, %v134_v46 }
  0xa4   :  { %539 = vmatpush3.bf16.xpose.msra.mxu0 %v244_v49 }
  0xa5   :  { %569 = vmatprep.subr.msk.bf16.mxu0 %vm212_vm0, %v135_v50 }
  0xac   :  { %541 = vmatpush3.bf16.xpose.msra.mxu0 %v247_v51 }
  0xb3   :  { %543 = vmatmul.mubr.msk.bf16.vlgmr.msra.gmra.mrb[0].mxu0 %vm212_vm0, %v585_v52 }
  0xb4   :  { %546 = vmatprep.mubr.msk.bf16.mxu0 %vm212_vm0, %v586_v53 }
  0xbb   :  { %547 = vmatmul.mubr.msk.bf16.gmra.mrb[4].mxu0 %vm212_vm0, %v587_v54 }
  0xf3   :  { %v155_v56 = vpop.permute.xlu0 %154 }
  0xf4   :  { %v165_v57 = vpop.permute.xlu1 %164 }
  0xf7   :  { %v160_v58 = vpop.permute.xlu0 %159 }
  0xf8   :  { %v170_v59 = vpop.permute.xlu1 %169 }
  0xfb   :  { %v175_v63 = vpop.permute.xlu0 %174 }
  0xfc   :  { %v180_v4 = vpop.permute.xlu1 %179 }
  0xff   :  { %v185_v11 = vpop.permute.xlu0 %184 }
 0x100   :  { %v190_v16 = vpop.permute.xlu1 %189 }
 0x103   :  { %v337_v29 = vpop.permute.xlu0 %336 }
 0x104   :  { %v342_v30 = vpop.permute.xlu1 %341 }
 0x107   :  { %v347_v31 = vpop.permute.xlu0 %346 }
 0x108   :  { %v352_v32 = vpop.permute.xlu1 %351 }
 0x10b   :  { %v431_v38 = vpop.permute.xlu0 %430 }
 0x10c   :  { %v436_v43 = vpop.permute.xlu1 %435 }
 0x10f   :  { %v441_v49 = vpop.permute.xlu0 %440 }
 0x110   :  { %v446_v52 = vpop.permute.xlu1 %445 }
 0x186   :  { %v544_v60 = vpop.f32.mrb[0].mxu0 }
 0x187   :  { %v292_v61 = vadd.f32 %v544_v60, %v165_v57  ;;  %v283_v62 = vpop.f32.mrb[1].mxu0 }
 0x188   :  { %v284_v0 = vadd.f32 %v283_v62, %v155_v56  ;;  %v545_v1 = vpop.f32.mrb[2].mxu0 }
 0x189   :  { %v295_v2 = vadd.f32 %v545_v1, %v170_v59  ;;  %v286_v3 = vpop.f32.mrb[3].mxu0  ;;  %v316_v6 = vmax.f32 %v292_v61, 0.0 }
 0x18a   :  { %v287_v5 = vadd.f32 %v286_v3, %v160_v58  ;;  %v314_v8 = vmax.f32 %v284_v0, 0.0  ;;  %v468_v58 = vshrl.u32 %v467_v55, 7 }
 0x18b   :  { %v317_v7 = vmax.f32 %v295_v2, 0.0 }
 0x18c   :  { %v315_v9 = vmax.f32 %v287_v5, 0.0  ;;  %v469_v61 = vsub.s32 0, %v468_v58 }
 0x18d   :  { %v327_v10 = vpack.c.bf16 %v317_v7, %v316_v6 }
 0x18e   :  { %v548_v12 = vpop.f32.mrb[4].mxu0  ;;  %v326_v13 = vpack.c.bf16 %v315_v9, %v314_v8 }
 0x18f   :  { %v308_v14 = vadd.f32 %v548_v12, %v185_v11  ;;  %v299_v15 = vpop.f32.mrb[5].mxu0 }
 0x190   :  { %v300_v17 = vadd.f32 %v299_v15, %v175_v63  ;;  %v549_v18 = vpop.f32.mrb[6].mxu0  ;;  %550 = vmatprep.subr.bf16.mxu1 %v326_v13  ;;  %v465_v63 = vpop.permute.xlu0 %464 }
 0x191   :  { %v311_v19 = vadd.f32 %v549_v18, %v190_v16  ;;  %v302_v20 = vpop.f32.mrb[7].mxu0  ;;  %551 = vmatpush3.bf16.msra.mxu1 %v326_v13  ;;  %v320_v22 = vmax.f32 %v308_v14, 0.0  ;;  %v470_v1 = vrot.slane %v465_v63, %v469_v61 }
 0x192   :  { %v303_v21 = vadd.f32 %v302_v20, %v180_v4  ;;  %552 = vmatprep.subr.bf16.mxu1 %v327_v10  ;;  %v318_v24 = vmax.f32 %v300_v17, 0.0 }
 0x193   :  { %v321_v23 = vmax.f32 %v311_v19, 0.0 }
 0x194   :  { %v319_v25 = vmax.f32 %v303_v21, 0.0 }
 0x195   :  { %v329_v26 = vpack.c.bf16 %v321_v23, %v320_v22  ;;  %553 = vmatpush3.bf16.msra.mxu1 %v327_v10 }
 0x196   :  { %v328_v27 = vpack.c.bf16 %v319_v25, %v318_v24 }
 0x198   :  { %554 = vmatprep.subr.bf16.mxu1 %v328_v27 }
 0x199   :  { %555 = vmatpush3.bf16.msra.mxu1 %v328_v27 }
 0x19a   :  { %556 = vmatprep.subr.bf16.mxu1 %v329_v26 }
 0x19d   :  { %557 = vmatpush3.bf16.msra.mxu1 %v329_v26 }
 0x1a0   :  { %559 = vmatmul.mubr.msk.bf16.vlgmr.msra.gmra.mrb[0].mxu1 %vm364_vm1, %v589_v28 }
 0x273   :  { %v560_v33 = vpop.f32.mrb[0].mxu1 }
 0x274   :  { %v405_v34 = vpop.f32.mrb[1].mxu1  ;;  %v414_v35 = vadd.f32 %v560_v33, %v347_v31 }
 0x275   :  { %v406_v36 = vadd.f32 %v405_v34, %v337_v29  ;;  %v561_v37 = vpop.f32.mrb[2].mxu1 }
 0x276   :  { %v408_v39 = vpop.f32.mrb[3].mxu1  ;;  %v417_v41 = vadd.f32 %v561_v37, %v352_v32  ;;  %v422_v44 = vmax.f32 %v414_v35, 0.0 }
 0x277   :  { %v420_v40 = vmax.f32 %v406_v36, 0.0  ;;  %v409_v42 = vadd.f32 %v408_v39, %v342_v30 }
 0x278   :  { %v423_v47 = vmax.f32 %v417_v41, 0.0  ;;  %v450_v50 = vmul.f32 %v441_v49, %v422_v44 }
 0x279   :  { %v421_v45 = vmax.f32 %v409_v42, 0.0  ;;  %v448_v46 = vmul.f32 %v431_v38, %v420_v40 }
 0x27a   :  { %v451_v53 = vmul.f32 %v446_v52, %v423_v47 }
 0x27b   :  { %v449_v48 = vmul.f32 %v436_v43, %v421_v45 }
 0x27d   :  { %v452_v51 = vadd.f32 %v449_v48, %v448_v46 }
 0x27f   :  { %v453_v54 = vadd.f32 %v452_v51, %v450_v50 }
 0x281   :  { %v454_v56 = vadd.f32 %v453_v54, %v451_v53 }
 0x283   :  { %v455_v57 = vrot.slane %v454_v56, 4 }
 0x285   :  { %v456_v59 = vadd.f32 %v455_v57, %v454_v56 }
 0x287   :  { %v457_v60 = vrot.slane %v456_v59, 2 }
 0x289   :  { %v458_v62 = vadd.f32 %v457_v60, %v456_v59 }
 0x28b   :  { %v459_v0 = vrot.slane %v458_v62, 1 }
 0x28d   :  { %v460_v2 = vadd.f32 %v459_v0, %v458_v62 }
 0x28f   :  { %v471_v3 = vadd.f32 %v470_v1, %v460_v2 }
 0x291   :  { %v472_v4 = vsub.f32 0.0, %v471_v3 }
 0x293   :  { %v473_v5 = vmul.f32 1.442695, %v472_v4 }
 0x295   :  { %590 = vpow2.f32 %v473_v5 }
 0x29f   :  { %v591_v6 = vpop.eup %590 }
 0x2a0   :  { %v475_v7 = vadd.f32 1.0, %v591_v6 }
 0x2a2   :  { %592 = vrcp.f32 %v475_v7 }
 0x2ac   :  { %v593_v8 = vpop.eup %592 }
 0x2ad   :  { %477 = vst [vmem:[#allocation14] sm:$0x1] %v593_v8 }
 0x2ae   :  { %737 = shalt.err (!%p734_p10)
}
 0x2af   :  { %s738_s19 = scalar_lea.hbm %s938_s7, 16 }
 0x2b0   :  { %p739_p11 = scmp.ne.s32.totalorder %s938_s7, %s738_s19  ;;  %p742_p12 = scmp.lt.u32.totalorder %s738_s19, %s938_s7 }
 0x2b2   :  { %p744_p13 = pnand %p742_p12, %p739_p11 }
 0x2b4   :  { %747 = shalt.err (!%p744_p13)
}
 0x2b5   :  { %487 = dma.vmem_to_hbm [thread:$0]  %s485_s3, 16, %s938_s7, [#allocation5]  }
 0x2b6   :  { %756 = dma.done.wait [#allocation5], 16  }
 0x2b7   :  { %757 = vsyncadd [#allocation5], 4294967280 }
 0x2b8   :  { %491 = vsyncpa [#allocation4], 1 }
 0x2b9   :  { %492 = vsyncpa [#allocation7], 1 }
 0x2ba   :  { %493 = vsyncpa [#allocation10], 1 }
 0x2bb   :  { %494 = vsyncpa [#allocation13], 1 }
 0x2bc   :  { %495 = vsyncpa [#allocation5], 1 }

</bundles_post_ra>
